<compile_context>
chip_gen: v6e
topology: v6e:2x2x1
jax: 0.10.0
libtpu: 0.0.40
codegen_flags: <defaults>
</compile_context>

<pallas_src>
import functools
import math

import jax
import jax.numpy as jnp
from jax.experimental import pallas as pl
from jax.experimental.pallas import tpu as pltpu

_LOG_2PI = math.log(2.0 * math.pi)
_LANES = 128
_MAX_TILE_SUBLANES = 1024  # (12, 1024, 128) f32 tile = 6 MiB (12 MiB double-buffered)


def _nll_kernel(x_ref, out_ref, *, batch_size, tile_sublanes, n_inner,
                ragged, first_masked_tile):
    # x_ref:  (12, TS, 128) packed as [mean0..2 | cov0..5 | true0..2].
    # out_ref: (1, TS, 128) f32, resident across the inner (reduction) axis;
    #          one such block per outer ("parallel") grid index.
    i = pl.program_id(0)
    j = pl.program_id(1)

    @pl.when(j == 0)
    def _init():
        out_ref[...] = jnp.zeros_like(out_ref)

    m0, m1, m2 = x_ref[0], x_ref[1], x_ref[2]          # means        (TS,128)
    c0, c1, c2 = x_ref[3], x_ref[4], x_ref[5]          # raw log-variances
    l10, l20, l21 = x_ref[6], x_ref[7], x_ref[8]       # off-diagonal L entries
    t0, t1, t2 = x_ref[9], x_ref[10], x_ref[11]        # true values

    var0 = jax.nn.softplus(c0) + 1e-4
    var1 = jax.nn.softplus(c1) + 1e-4
    var2 = jax.nn.softplus(c2) + 1e-4

    # rsqrt-and-multiply instead of sqrt+divide (fewer EUP pushes).
    inv_l00 = jax.lax.rsqrt(var0)
    inv_l11 = jax.lax.rsqrt(var1)
    inv_l22 = jax.lax.rsqrt(var2)

    d0 = t0 - m0
    d1 = t1 - m1
    d2 = t2 - m2

    # Forward substitution: z = L^-1 diff  =>  mahalanobis = ||z||^2.
    z0 = d0 * inv_l00
    z1 = (d1 - l10 * z0) * inv_l11
    z2 = (d2 - l20 * z0 - l21 * z1) * inv_l22
    mahalanobis = z0 * z0 + z1 * z1 + z2 * z2

    log_det = jnp.log(var0 * var1 * var2)
    nll = 0.5 * (mahalanobis + log_det + 3.0 * _LOG_2PI)  # (TS, 128)

    if ragged:
        tile_idx = i * n_inner + j
        needs_mask = tile_idx >= first_masked_tile

        # Only tiles that can contain batch padding pay for the mask.
        @pl.when(needs_mask)
        def _masked_acc():
            s_idx = jax.lax.broadcasted_iota(jnp.int32, nll.shape, 0)
            l_idx = jax.lax.broadcasted_iota(jnp.int32, nll.shape, 1)
            gidx = (tile_idx * tile_sublanes + s_idx) * _LANES + l_idx
            out_ref[...] += jnp.where(gidx < batch_size, nll, 0.0)[None]

        @pl.when(jnp.logical_not(needs_mask))
        def _full_acc():
            out_ref[...] += nll[None]
    else:
        out_ref[...] += nll[None]


def multivariate_nll_loss(mean_predictions, cov_params, true_values):
    """mean_predictions: [B,3], cov_params: [B,6], true_values: [B,3] -> scalar."""
    b = mean_predictions.shape[0]

    # Single packed (B, 12) array -> one pad + one transpose + one reshape.
    # TODO(synk): if the producing model can emit feature-major (12, B) data
    # directly, this repack (an extra full HBM pass if XLA fuses it, ~3x HBM
    # traffic if it doesn't) disappears entirely — biggest remaining lever.
    packed = jnp.concatenate(
        [
            jnp.asarray(mean_predictions, jnp.float32),
            jnp.asarray(cov_params, jnp.float32),
            jnp.asarray(true_values, jnp.float32),
        ],
        axis=1,
    )  # (B, 12)

    nblk = pl.cdiv(b, _LANES)                            # 128-lane batch blocks
    ts = min(_MAX_TILE_SUBLANES, pl.cdiv(nblk, 8) * 8)   # sublane rows / tile
    # Megacore: shard the batch across 2 TensorCores (v7x) when there is enough
    # work for more than one max-size tile.  No-op cost on v5e/v6e (1 TC/chip).
    n_outer = 2 if nblk > ts else 1
    n_inner = pl.cdiv(nblk, n_outer * ts)
    # Re-balance the tile so the (n_outer * n_inner) grid covers the batch with
    # minimal padding (keeps HBM reads of padded zeros to < one tile).
    ts = min(ts, pl.cdiv(pl.cdiv(nblk, n_outer * n_inner), 8) * 8)
    n_tiles_total = n_outer * n_inner
    nblk_p = n_tiles_total * ts                          # padded block count
    bp = nblk_p * _LANES                                 # padded batch size

    if bp != b:
        packed = jnp.pad(packed, ((0, bp - b), (0, 0)))

    # Feature-major, batch on (sublane, lane): (12, nblk_p, 128).
    packed_fm = packed.T.reshape(12, nblk_p, _LANES)

    tile_samples = ts * _LANES
    ragged = bp != b
    first_masked_tile = b // tile_samples if ragged else n_tiles_total

    kernel = functools.partial(
        _nll_kernel,
        batch_size=b,
        tile_sublanes=ts,
        n_inner=n_inner,
        ragged=ragged,
        first_masked_tile=first_masked_tile,
    )

    partial = pl.pallas_call(
        kernel,
        out_shape=jax.ShapeDtypeStruct((n_outer, ts, _LANES), jnp.float32),
        grid=(n_outer, n_inner),
        in_specs=[
            pl.BlockSpec((12, ts, _LANES), lambda i, j: (0, i * n_inner + j, 0)),
        ],
        # Output block is the per-core accumulator, resident across the inner
        # (reduction) axis; each outer index owns a distinct block.
        out_specs=pl.BlockSpec((1, ts, _LANES), lambda i, j: (i, 0, 0)),
        compiler_params=pltpu.CompilerParams(
            dimension_semantics=("parallel", "arbitrary"),
        ),
    )(packed_fm)

    # Tiny cross-core / cross-lane reduction and mean in the wrapper.
    return jnp.sum(partial) / b


def _reference_nll(mean_predictions, cov_params, true_values):
    """Pure-JAX reference mirroring the PyTorch module (explicit inverse/det)."""
    b = cov_params.shape[0]
    var = jax.nn.softplus(cov_params[:, 0:3]) + 1e-4
    L = jnp.zeros((b, 3, 3), jnp.float32)
    L = L.at[:, 0, 0].set(jnp.sqrt(var[:, 0]))
    L = L.at[:, 1, 0].set(cov_params[:, 3])
    L = L.at[:, 1, 1].set(jnp.sqrt(var[:, 1]))
    L = L.at[:, 2, 0].set(cov_params[:, 4])
    L = L.at[:, 2, 1].set(cov_params[:, 5])
    L = L.at[:, 2, 2].set(jnp.sqrt(var[:, 2]))
    cov = L @ jnp.swapaxes(L, 1, 2)
    cov_inv = jnp.linalg.inv(cov)
    cov_det = jnp.linalg.det(cov)
    diff = (true_values - mean_predictions)[..., None]
    maha = (jnp.swapaxes(diff, 1, 2) @ cov_inv @ diff).squeeze()
    nll = 0.5 * (maha + jnp.log(cov_det) + 3.0 * _LOG_2PI)
    return jnp.mean(nll)


if __name__ == "__main__":
    key = jax.random.PRNGKey(0)
    k1, k2, k3 = jax.random.split(key, 3)
    B = 8
    mean_predictions = jax.random.normal(k1, (B, 3), jnp.float32)
    cov_params = jax.random.normal(k2, (B, 6), jnp.float32)
    true_values = jax.random.normal(k3, (B, 3), jnp.float32)

    loss = multivariate_nll_loss(mean_predictions, cov_params, true_values)
    jax.block_until_ready(loss)

    ref = _reference_nll(mean_predictions, cov_params, true_values)
    assert jnp.isfinite(loss), "kernel produced non-finite loss"
    assert jnp.allclose(loss, ref, rtol=1e-3, atol=1e-3), (loss, ref)

    print("KERNEL_OK")
</pallas_src>

<mosaic_0001>
module attributes {stable_mosaic.version = 11 : i64} {
  func.func @_nll_kernel(%arg0: i32, %arg1: i32, %arg2: memref<12x8x128xf32, #tpu.memory_space<vmem>>, %arg3: memref<1x8x128xf32, #tpu.memory_space<vmem>>) attributes {dimension_semantics = [#tpu.dimension_semantics<parallel>, #tpu.dimension_semantics<arbitrary>], iteration_bounds = array<i64: 1, 1>, scalar_prefetch = 0 : i64, scratch_operands = 0 : i64, tpu.core_type = #tpu.core_type<tc>, window_params = [{transform_indices = @transform_0, window_bounds = array<i64: 12, 8, 128>}, {transform_indices = @transform_1, window_bounds = array<i64: 1, 8, 128>}]} {
    %c0_i32 = arith.constant 0 : i32
    %0 = arith.cmpi eq, %arg1, %c0_i32 : i32
    %1 = arith.extui %0 : i1 to i32
    %c0_i32_0 = arith.constant 0 : i32
    %2 = arith.cmpi ne, %1, %c0_i32_0 : i32
    scf.if %2 {
      %cst_38 = arith.constant 0.000000e+00 : f32
      %111 = vector.broadcast %cst_38 : f32 to vector<1x8x128xf32>
      %c0_39 = arith.constant 0 : index
      %c0_40 = arith.constant 0 : index
      %c0_41 = arith.constant 0 : index
      %112 = vector.load %arg3[%c0_39, %c0_40, %c0_41] : memref<1x8x128xf32, #tpu.memory_space<vmem>>, vector<1x8x128xf32>
      tpu.vector_store %arg3[%c0_39, %c0_40, %c0_41], %111 {strides = array<i32>} : memref<1x8x128xf32, #tpu.memory_space<vmem>>, vector<1x8x128xf32>,
    } else {
    }
    %c0 = arith.constant 0 : index
    %c0_1 = arith.constant 0 : index
    %c0_2 = arith.constant 0 : index
    %3 = vector.load %arg2[%c0, %c0_1, %c0_2] : memref<12x8x128xf32, #tpu.memory_space<vmem>>, vector<1x8x128xf32>
    %4 = vector.shape_cast %3 : vector<1x8x128xf32> to vector<8x128xf32>
    %c1 = arith.constant 1 : index
    %c0_3 = arith.constant 0 : index
    %c0_4 = arith.constant 0 : index
    %5 = vector.load %arg2[%c1, %c0_3, %c0_4] : memref<12x8x128xf32, #tpu.memory_space<vmem>>, vector<1x8x128xf32>
    %6 = vector.shape_cast %5 : vector<1x8x128xf32> to vector<8x128xf32>
    %c2 = arith.constant 2 : index
    %c0_5 = arith.constant 0 : index
    %c0_6 = arith.constant 0 : index
    %7 = vector.load %arg2[%c2, %c0_5, %c0_6] : memref<12x8x128xf32, #tpu.memory_space<vmem>>, vector<1x8x128xf32>
    %8 = vector.shape_cast %7 : vector<1x8x128xf32> to vector<8x128xf32>
    %c3 = arith.constant 3 : index
    %c0_7 = arith.constant 0 : index
    %c0_8 = arith.constant 0 : index
    %9 = vector.load %arg2[%c3, %c0_7, %c0_8] : memref<12x8x128xf32, #tpu.memory_space<vmem>>, vector<1x8x128xf32>
    %10 = vector.shape_cast %9 : vector<1x8x128xf32> to vector<8x128xf32>
    %c4 = arith.constant 4 : index
    %c0_9 = arith.constant 0 : index
    %c0_10 = arith.constant 0 : index
    %11 = vector.load %arg2[%c4, %c0_9, %c0_10] : memref<12x8x128xf32, #tpu.memory_space<vmem>>, vector<1x8x128xf32>
    %12 = vector.shape_cast %11 : vector<1x8x128xf32> to vector<8x128xf32>
    %c5 = arith.constant 5 : index
    %c0_11 = arith.constant 0 : index
    %c0_12 = arith.constant 0 : index
    %13 = vector.load %arg2[%c5, %c0_11, %c0_12] : memref<12x8x128xf32, #tpu.memory_space<vmem>>, vector<1x8x128xf32>
    %14 = vector.shape_cast %13 : vector<1x8x128xf32> to vector<8x128xf32>
    %c6 = arith.constant 6 : index
    %c0_13 = arith.constant 0 : index
    %c0_14 = arith.constant 0 : index
    %15 = vector.load %arg2[%c6, %c0_13, %c0_14] : memref<12x8x128xf32, #tpu.memory_space<vmem>>, vector<1x8x128xf32>
    %16 = vector.shape_cast %15 : vector<1x8x128xf32> to vector<8x128xf32>
    %c7 = arith.constant 7 : index
    %c0_15 = arith.constant 0 : index
    %c0_16 = arith.constant 0 : index
    %17 = vector.load %arg2[%c7, %c0_15, %c0_16] : memref<12x8x128xf32, #tpu.memory_space<vmem>>, vector<1x8x128xf32>
    %18 = vector.shape_cast %17 : vector<1x8x128xf32> to vector<8x128xf32>
    %c8 = arith.constant 8 : index
    %c0_17 = arith.constant 0 : index
    %c0_18 = arith.constant 0 : index
    %19 = vector.load %arg2[%c8, %c0_17, %c0_18] : memref<12x8x128xf32, #tpu.memory_space<vmem>>, vector<1x8x128xf32>
    %20 = vector.shape_cast %19 : vector<1x8x128xf32> to vector<8x128xf32>
    %c9 = arith.constant 9 : index
    %c0_19 = arith.constant 0 : index
    %c0_20 = arith.constant 0 : index
    %21 = vector.load %arg2[%c9, %c0_19, %c0_20] : memref<12x8x128xf32, #tpu.memory_space<vmem>>, vector<1x8x128xf32>
    %22 = vector.shape_cast %21 : vector<1x8x128xf32> to vector<8x128xf32>
    %c10 = arith.constant 10 : index
    %c0_21 = arith.constant 0 : index
    %c0_22 = arith.constant 0 : index
    %23 = vector.load %arg2[%c10, %c0_21, %c0_22] : memref<12x8x128xf32, #tpu.memory_space<vmem>>, vector<1x8x128xf32>
    %24 = vector.shape_cast %23 : vector<1x8x128xf32> to vector<8x128xf32>
    %c11 = arith.constant 11 : index
    %c0_23 = arith.constant 0 : index
    %c0_24 = arith.constant 0 : index
    %25 = vector.load %arg2[%c11, %c0_23, %c0_24] : memref<12x8x128xf32, #tpu.memory_space<vmem>>, vector<1x8x128xf32>
    %26 = vector.shape_cast %25 : vector<1x8x128xf32> to vector<8x128xf32>
    %cst = arith.constant 0.000000e+00 : f32
    %27 = vector.broadcast %cst : f32 to vector<8x128xf32>
    %28 = arith.maximumf %10, %27 : vector<8x128xf32>
    %29 = vector.broadcast %cst : f32 to vector<8x128xf32>
    %30 = arith.subf %10, %29 : vector<8x128xf32>
    %31 = arith.cmpf one, %30, %30 : vector<8x128xf32>
    %32 = vector.broadcast %cst : f32 to vector<8x128xf32>
    %33 = arith.addf %10, %32 : vector<8x128xf32>
    %34 = math.absf %30 : vector<8x128xf32>
    %cst_25 = arith.constant 0.000000e+00 : f32
    %35 = vector.broadcast %cst_25 : f32 to vector<8x128xf32>
    %36 = arith.subf %35, %34 : vector<8x128xf32>
    %37 = math.exp %36 : vector<8x128xf32>
    %38 = math.log1p %37 : vector<8x128xf32>
    %39 = arith.addf %28, %38 : vector<8x128xf32>
    %40 = arith.select %31, %33, %39 : vector<8x128xi1>, vector<8x128xf32>
    %cst_26 = arith.constant 9.99999974E-5 : f32
    %41 = vector.broadcast %cst_26 : f32 to vector<8x128xf32>
    %42 = arith.addf %40, %41 : vector<8x128xf32>
    %cst_27 = arith.constant 0.000000e+00 : f32
    %43 = vector.broadcast %cst_27 : f32 to vector<8x128xf32>
    %44 = arith.maximumf %12, %43 : vector<8x128xf32>
    %45 = vector.broadcast %cst_27 : f32 to vector<8x128xf32>
    %46 = arith.subf %12, %45 : vector<8x128xf32>
    %47 = arith.cmpf one, %46, %46 : vector<8x128xf32>
    %48 = vector.broadcast %cst_27 : f32 to vector<8x128xf32>
    %49 = arith.addf %12, %48 : vector<8x128xf32>
    %50 = math.absf %46 : vector<8x128xf32>
    %cst_28 = arith.constant 0.000000e+00 : f32
    %51 = vector.broadcast %cst_28 : f32 to vector<8x128xf32>
    %52 = arith.subf %51, %50 : vector<8x128xf32>
    %53 = math.exp %52 : vector<8x128xf32>
    %54 = math.log1p %53 : vector<8x128xf32>
    %55 = arith.addf %44, %54 : vector<8x128xf32>
    %56 = arith.select %47, %49, %55 : vector<8x128xi1>, vector<8x128xf32>
    %cst_29 = arith.constant 9.99999974E-5 : f32
    %57 = vector.broadcast %cst_29 : f32 to vector<8x128xf32>
    %58 = arith.addf %56, %57 : vector<8x128xf32>
    %cst_30 = arith.constant 0.000000e+00 : f32
    %59 = vector.broadcast %cst_30 : f32 to vector<8x128xf32>
    %60 = arith.maximumf %14, %59 : vector<8x128xf32>
    %61 = vector.broadcast %cst_30 : f32 to vector<8x128xf32>
    %62 = arith.subf %14, %61 : vector<8x128xf32>
    %63 = arith.cmpf one, %62, %62 : vector<8x128xf32>
    %64 = vector.broadcast %cst_30 : f32 to vector<8x128xf32>
    %65 = arith.addf %14, %64 : vector<8x128xf32>
    %66 = math.absf %62 : vector<8x128xf32>
    %cst_31 = arith.constant 0.000000e+00 : f32
    %67 = vector.broadcast %cst_31 : f32 to vector<8x128xf32>
    %68 = arith.subf %67, %66 : vector<8x128xf32>
    %69 = math.exp %68 : vector<8x128xf32>
    %70 = math.log1p %69 : vector<8x128xf32>
    %71 = arith.addf %60, %70 : vector<8x128xf32>
    %72 = arith.select %63, %65, %71 : vector<8x128xi1>, vector<8x128xf32>
    %cst_32 = arith.constant 9.99999974E-5 : f32
    %73 = vector.broadcast %cst_32 : f32 to vector<8x128xf32>
    %74 = arith.addf %72, %73 : vector<8x128xf32>
    %75 = math.rsqrt %42 : vector<8x128xf32>
    %76 = math.rsqrt %58 : vector<8x128xf32>
    %77 = math.rsqrt %74 : vector<8x128xf32>
    %78 = arith.subf %22, %4 : vector<8x128xf32>
    %79 = arith.subf %24, %6 : vector<8x128xf32>
    %80 = arith.subf %26, %8 : vector<8x128xf32>
    %81 = arith.mulf %78, %75 : vector<8x128xf32>
    %82 = arith.mulf %16, %81 : vector<8x128xf32>
    %83 = arith.subf %79, %82 : vector<8x128xf32>
    %84 = arith.mulf %83, %76 : vector<8x128xf32>
    %85 = arith.mulf %18, %81 : vector<8x128xf32>
    %86 = arith.subf %80, %85 : vector<8x128xf32>
    %87 = arith.mulf %20, %84 : vector<8x128xf32>
    %88 = arith.subf %86, %87 : vector<8x128xf32>
    %89 = arith.mulf %88, %77 : vector<8x128xf32>
    %90 = arith.mulf %81, %81 : vector<8x128xf32>
    %91 = arith.mulf %84, %84 : vector<8x128xf32>
    %92 = arith.addf %90, %91 : vector<8x128xf32>
    %93 = arith.mulf %89, %89 : vector<8x128xf32>
    %94 = arith.addf %92, %93 : vector<8x128xf32>
    %95 = arith.mulf %42, %58 : vector<8x128xf32>
    %96 = arith.mulf %95, %74 : vector<8x128xf32>
    %97 = math.log %96 : vector<8x128xf32>
    %98 = arith.addf %94, %97 : vector<8x128xf32>
    %cst_33 = arith.constant 5.51363134 : f32
    %99 = vector.broadcast %cst_33 : f32 to vector<8x128xf32>
    %100 = arith.addf %98, %99 : vector<8x128xf32>
    %cst_34 = arith.constant 5.000000e-01 : f32
    %101 = vector.broadcast %cst_34 : f32 to vector<8x128xf32>
    %102 = arith.mulf %101, %100 : vector<8x128xf32>
    %c1_i32 = arith.constant 1 : i32
    %103 = arith.muli %arg0, %c1_i32 : i32
    %104 = arith.addi %103, %arg1 : i32
    %c0_i32_35 = arith.constant 0 : i32
    %105 = arith.cmpi sge, %104, %c0_i32_35 : i32
    %106 = arith.extui %105 : i1 to i32
    %c0_i32_36 = arith.constant 0 : i32
    %107 = arith.cmpi ne, %106, %c0_i32_36 : i32
    scf.if %107 {
      %111 = tpu.iota {dimensions = array<i32: 0>} : vector<8x128xi32>
      %112 = tpu.iota {dimensions = array<i32: 1>} : vector<8x128xi32>
      %c8_i32 = arith.constant 8 : i32
      %113 = arith.muli %104, %c8_i32 : i32
      %114 = vector.broadcast %113 : i32 to vector<8x128xi32>
      %115 = arith.addi %114, %111 : vector<8x128xi32>
      %c128_i32 = arith.constant 128 : i32
      %116 = vector.broadcast %c128_i32 : i32 to vector<8x128xi32>
      %117 = arith.muli %115, %116 : vector<8x128xi32>
      %118 = arith.addi %117, %112 : vector<8x128xi32>
      %c0_38 = arith.constant 0 : index
      %c0_39 = arith.constant 0 : index
      %c0_40 = arith.constant 0 : index
      %119 = vector.load %arg3[%c0_38, %c0_39, %c0_40] : memref<1x8x128xf32, #tpu.memory_space<vmem>>, vector<1x8x128xf32>
      %c8_i32_41 = arith.constant 8 : i32
      %120 = vector.broadcast %c8_i32_41 : i32 to vector<8x128xi32>
      %121 = arith.cmpi slt, %118, %120 : vector<8x128xi32>
      %cst_42 = arith.constant 0.000000e+00 : f32
      %122 = vector.broadcast %cst_42 : f32 to vector<8x128xf32>
      %123 = arith.select %121, %102, %122 : vector<8x128xi1>, vector<8x128xf32>
      %124 = vector.shape_cast %123 : vector<8x128xf32> to vector<1x8x128xf32>
      %125 = arith.addf %119, %124 : vector<1x8x128xf32>
      %c0_43 = arith.constant 0 : index
      %c0_44 = arith.constant 0 : index
      %c0_45 = arith.constant 0 : index
      %126 = vector.load %arg3[%c0_43, %c0_44, %c0_45] : memref<1x8x128xf32, #tpu.memory_space<vmem>>, vector<1x8x128xf32>
      tpu.vector_store %arg3[%c0_43, %c0_44, %c0_45], %125 {strides = array<i32>} : memref<1x8x128xf32, #tpu.memory_space<vmem>>, vector<1x8x128xf32>,
    } else {
    }
    %true = arith.constant true
    %108 = arith.xori %105, %true : i1
    %109 = arith.extui %108 : i1 to i32
    %c0_i32_37 = arith.constant 0 : i32
    %110 = arith.cmpi ne, %109, %c0_i32_37 : i32
    scf.if %110 {
      %c0_38 = arith.constant 0 : index
      %c0_39 = arith.constant 0 : index
      %c0_40 = arith.constant 0 : index
      %111 = vector.load %arg3[%c0_38, %c0_39, %c0_40] : memref<1x8x128xf32, #tpu.memory_space<vmem>>, vector<1x8x128xf32>
      %112 = vector.shape_cast %102 : vector<8x128xf32> to vector<1x8x128xf32>
      %113 = arith.addf %111, %112 : vector<1x8x128xf32>
      %c0_41 = arith.constant 0 : index
      %c0_42 = arith.constant 0 : index
      %c0_43 = arith.constant 0 : index
      %114 = vector.load %arg3[%c0_41, %c0_42, %c0_43] : memref<1x8x128xf32, #tpu.memory_space<vmem>>, vector<1x8x128xf32>
      tpu.vector_store %arg3[%c0_41, %c0_42, %c0_43], %113 {strides = array<i32>} : memref<1x8x128xf32, #tpu.memory_space<vmem>>, vector<1x8x128xf32>,
    } else {
    }
    return
  }
  func.func @transform_0(%arg0: i32, %arg1: i32) -> (i32, i32, i32) {
    %c1_i32 = arith.constant 1 : i32
    %0 = arith.muli %arg0, %c1_i32 : i32
    %1 = arith.addi %0, %arg1 : i32
    %c0_i32 = arith.constant 0 : i32
    %c0_i32_0 = arith.constant 0 : i32
    %c0_i32_1 = arith.constant 0 : i32
    return %c0_i32, %1, %c0_i32_0 : i32, i32, i32
  }
  func.func @transform_1(%arg0: i32, %arg1: i32) -> (i32, i32, i32) {
    %c0_i32 = arith.constant 0 : i32
    %c0_i32_0 = arith.constant 0 : i32
    %c0_i32_1 = arith.constant 0 : i32
    return %arg0, %c0_i32, %c0_i32_0 : i32, i32, i32
  }
}

</mosaic_0001>

<bundles_post_ra>
// kernel: tpu_custom_call.1
= control target key start
LH: loop header
LB: loop body
LE: loop exit
PB: predicated region body
PF: predicated region fallthrough
CT: control target
= control target key end

     0   :  { %6 = vsyncpa [#allocation3], 0  ;;  %s269_s0 = inlined_call_operand.hbm [shape: f32[12,8,128], index: 0, kind: input, shape index: {}]   ;;  %s270_s1 = inlined_call_operand.hbm [shape: f32[1,8,128], index: 1, kind: output, shape index: {}]  }
   0x1   :  { %7 = vsyncpa [#allocation4], 0  ;;  %s249_s6 = smov [#allocation2]  }
   0x2   :  { %s16_s7 = sshll.u32 %s249_s6, 4  ;;  %s17_s7 = int_to_ptr.vmem [resolvable:$true] %s16_s7 }
   0x3   :  { %s213_s8 = scalar_lea.vmem %s17_s7, 1536  ;;  %p218_p1 = scmp.lt.s32.totalorder %s17_s7, %s17_s7 }
   0x4   :  { %p214_p0 = scmp.ne.s32.totalorder %s17_s7, %s213_s8  ;;  %p219_p2 = scmp.lt.s32.totalorder %s213_s8, %s213_s8 }
   0x6   :  { %p220_p3 = por %p219_p2, %p218_p1 }
   0x8   :  { %p221_p4 = pnand %p220_p3, %p214_p0 }
   0xa   :  { %224 = shalt.err (!%p221_p4)
}
   0xb   :  { %s250_s9 = smov 128   ;;  %s251_s10 = smov 8  }
   0xc   :  { %22 = dma.hbm_to_vmem [thread:$0]  %s269_s0, 1536, %s17_s7, [#allocation3], %s250_s9, %s250_s9, %s251_s10  }
   0xd   :  { %245 = dma.done.wait [#allocation3], 1536  }
   0xe   :  { %246 = vsyncadd [#allocation3], 4294965760  ;;  %v38_v0 = vld [vmem:[#allocation2 + $0x18] sm:$0xff]  ;;  %v40_v1 = vld [vmem:[#allocation2 + $0x20] sm:$0xff]  ;;  %s252_s0 = smov [#allocation5]  }
   0xf   :  { %v42_v2 = vld [vmem:[#allocation2 + $0x28] sm:$0xff]  ;;  %v58_v3 = vand.u32 2147483647, %v38_v0  ;;  %v77_v4 = vand.u32 2147483647, %v40_v1  ;;  %v55_v29 = vmax.f32 %v38_v0, 0.0  ;;  %vm56_vm3 = vcmp.ne.f32.partialorder %v38_v0, %v38_v0 }
  0x10   :  { %v96_v6 = vand.u32 2147483647, %v42_v2  ;;  %v74_v33 = vmax.f32 %v40_v1, 0.0  ;;  %vm75_vm4 = vcmp.ne.f32.partialorder %v40_v1, %v40_v1  ;;  %v93_v41 = vmax.f32 %v42_v2, 0.0  ;;  %v32_v52 = vld [vmem:[#allocation2] sm:$0xff]  ;;  %v50_v53 = vld [vmem:[#allocation2 + $0x48] sm:$0xff] }
  0x11   :  { %v59_v5 = vsub.f32 0.0, %v58_v3  ;;  %v78_v7 = vsub.f32 0.0, %v77_v4  ;;  %vm94_vm5 = vcmp.ne.f32.partialorder %v42_v2, %v42_v2  ;;  %v115_v55 = vsub.f32 %v50_v53, %v32_v52  ;;  %v34_v56 = vld [vmem:[#allocation2 + $0x8] sm:$0xff]  ;;  %v52_v57 = vld [vmem:[#allocation2 + $0x50] sm:$0xff]  ;;  %v46_v61 = vld [vmem:[#allocation2 + $0x38] sm:$0xff]  ;;  %s171_s13 = sshll.u32 %s252_s0, 4  ;;  %s172_s13 = int_to_ptr.vmem [resolvable:$true] %s171_s13 }
  0x12   :  { %v97_v9 = vsub.f32 0.0, %v96_v6  ;;  %v36_v58 = vld [vmem:[#allocation2 + $0x10] sm:$0xff]  ;;  %v54_v62 = vld [vmem:[#allocation2 + $0x58] sm:$0xff]  ;;  %v116_v63 = vsub.f32 %v52_v57, %v34_v56  ;;  %v48_v6 = vld [vmem:[#allocation2 + $0x40] sm:$0xff]  ;;  %s225_s14 = scalar_lea.vmem %s172_s13, 128  ;;  %p230_p6 = scmp.lt.s32.totalorder %s172_s13, %s172_s13 }
  0x13   :  { %v60_v8 = vmul.f32 1.442695, %v59_v5  ;;  %v79_v10 = vmul.f32 1.442695, %v78_v7  ;;  %v44_v60 = vld [vmem:[#allocation2 + $0x30] sm:$0xff]  ;;  %v144_v7 = vlaneseq  ;;  %p226_p5 = scmp.ne.s32.totalorder %s172_s13, %s225_s14  ;;  %p231_p7 = scmp.lt.s32.totalorder %s225_s14, %s225_s14 }
  0x14   :  { %v98_v11 = vmul.f32 1.442695, %v97_v9 }
  0x15   :  { %185 = vpow2.f32 %v60_v8  ;;  %p232_p8 = por %p231_p7, %p230_p6 }
  0x16   :  { %187 = vpow2.f32 %v79_v10 }
  0x17   :  { %189 = vpow2.f32 %v98_v11  ;;  %p233_p9 = pnand %p232_p8, %p226_p5 }
  0x22   :  { %v186_v12 = vpop.eup %185 }
  0x23   :  { %v188_v13 = vpop.eup %187  ;;  %v62_v14 = vadd.f32 1.0, %v186_v12  ;;  %v65_v18 = vmul.f32 -0.5, %v186_v12  ;;  %v68_v22 = vand.u32 2147483647, %v186_v12 }
  0x24   :  { %v190_v15 = vpop.eup %189  ;;  %v81_v16 = vadd.f32 1.0, %v188_v13  ;;  %v84_v19 = vmul.f32 -0.5, %v188_v13  ;;  %v87_v24 = vand.u32 2147483647, %v188_v13 }
  0x25   :  { %191 = vlog2.f32 %v62_v14  ;;  %v100_v17 = vadd.f32 1.0, %v190_v15  ;;  %v103_v20 = vmul.f32 -0.5, %v190_v15  ;;  %v66_v21 = vadd.f32 1.0, %v65_v18 }
  0x26   :  { %193 = vlog2.f32 %v81_v16  ;;  %v85_v23 = vadd.f32 1.0, %v84_v19  ;;  %v106_v26 = vand.u32 2147483647, %v190_v15  ;;  %vm69_vm0 = vcmp.lt.f32.partialorder %v68_v22, 0.0004427343 }
  0x27   :  { %195 = vlog2.f32 %v100_v17  ;;  %v104_v25 = vadd.f32 1.0, %v103_v20  ;;  %v67_v27 = vmul.f32 %v186_v12, %v66_v21  ;;  %vm88_vm1 = vcmp.lt.f32.partialorder %v87_v24, 0.0004427343 }
  0x28   :  { %v86_v30 = vmul.f32 %v188_v13, %v85_v23  ;;  %vm107_vm2 = vcmp.lt.f32.partialorder %v106_v26, 0.0004427343  ;;  %v145_v14 = vshrl.u32 %v144_v7, 7  ;;  %v147_v19 = vand.u32 127, %v144_v7 }
  0x29   :  { %v105_v34 = vmul.f32 %v190_v15, %v104_v25 }
  0x2a   :  { %v151_v20 = vmul.u32 128, %v145_v14 }
  0x2c   :  { %v152_v24 = vadd.s32 %v151_v20, %v147_v19 }
  0x2e   :  { %vm154_vm6 = vcmp.lt.s32.totalorder %v152_v24, 8 }
  0x32   :  { %v192_v28 = vpop.eup %191 }
  0x33   :  { %v194_v31 = vpop.eup %193  ;;  %v64_v32 = vmul.f32 0.6931472, %v192_v28 }
  0x34   :  { %v196_v35 = vpop.eup %195  ;;  %v83_v36 = vmul.f32 0.6931472, %v194_v31 }
  0x35   :  { %v70_v37 = vsel %vm69_vm0, %v67_v27, %v64_v32  ;;  %v102_v38 = vmul.f32 0.6931472, %v196_v35 }
  0x36   :  { %v71_v39 = vadd.f32 %v70_v37, %v55_v29  ;;  %v89_v40 = vsel %vm88_vm1, %v86_v30, %v83_v36 }
  0x37   :  { %v90_v42 = vadd.f32 %v89_v40, %v74_v33  ;;  %v108_v43 = vsel %vm107_vm2, %v105_v34, %v102_v38 }
  0x38   :  { %v72_v44 = vsel %vm56_vm3, %v38_v0, %v71_v39  ;;  %v109_v47 = vadd.f32 %v108_v43, %v93_v41 }
  0x39   :  { %v73_v45 = vadd.f32 0.0001, %v72_v44  ;;  %v91_v46 = vsel %vm75_vm4, %v40_v1, %v90_v42  ;;  %v117_v1 = vsub.f32 %v54_v62, %v36_v58 }
  0x3a   :  { %v92_v48 = vadd.f32 0.0001, %v91_v46  ;;  %v110_v49 = vsel %vm94_vm5, %v42_v2, %v109_v47 }
  0x3b   :  { %197 = vrsqrt.f32 %v73_v45  ;;  %v111_v51 = vadd.f32 0.0001, %v110_v49 }
  0x3c   :  { %199 = vrsqrt.f32 %v92_v48  ;;  %v132_v50 = vmul.f32 %v92_v48, %v73_v45 }
  0x3d   :  { %201 = vrsqrt.f32 %v111_v51 }
  0x3e   :  { %v133_v54 = vmul.f32 %v132_v50, %v111_v51 }
  0x40   :  { %203 = vlog2.f32 %v133_v54 }
  0x48   :  { %v198_v59 = vpop.eup %197 }
  0x49   :  { %v118_v0 = vmul.f32 %v198_v59, %v115_v55  ;;  %v200_v4 = vpop.eup %199 }
  0x4a   :  { %v202_v13 = vpop.eup %201 }
  0x4b   :  { %v119_v2 = vmul.f32 %v118_v0, %v44_v60  ;;  %v122_v3 = vmul.f32 %v118_v0, %v46_v61  ;;  %v127_v11 = vmul.f32 %v118_v0, %v118_v0 }
  0x4d   :  { %v120_v5 = vsub.f32 %v116_v63, %v119_v2  ;;  %v123_v9 = vsub.f32 %v117_v1, %v122_v3  ;;  %v204_v16 = vpop.eup %203 }
  0x4e   :  { %v135_v22 = vmul.f32 0.6931472, %v204_v16 }
  0x4f   :  { %v121_v8 = vmul.f32 %v200_v4, %v120_v5 }
  0x51   :  { %v124_v10 = vmul.f32 %v121_v8, %v48_v6  ;;  %v128_v12 = vmul.f32 %v121_v8, %v121_v8 }
  0x53   :  { %v125_v15 = vsub.f32 %v123_v9, %v124_v10  ;;  %v129_v18 = vadd.f32 %v128_v12, %v127_v11 }
  0x55   :  { %v126_v17 = vmul.f32 %v202_v13, %v125_v15 }
  0x57   :  { %v130_v21 = vmul.f32 %v126_v17, %v126_v17 }
  0x59   :  { %v131_v23 = vadd.f32 %v130_v21, %v129_v18 }
  0x5b   :  { %v136_v25 = vadd.f32 %v135_v22, %v131_v23 }
  0x5d   :  { %v137_v26 = vadd.f32 5.5136313, %v136_v25 }
  0x5f   :  { %v138_v27 = vmul.f32 0.5, %v137_v26 }
  0x61   :  { %v155_v28 = vsel %vm154_vm6, %v138_v27, 0.0 }
  0x62   :  { %157 = vst [vmem:[#allocation5] sm:$0xff] %v155_v28 }
  0x63   :  { %236 = shalt.err (!%p233_p9)
}
  0x64   :  { %174 = dma.vmem_to_hbm [thread:$0]  %s172_s13, 128, %s270_s1, [#allocation4]  }
  0x65   :  { %247 = dma.done.wait [#allocation4], 128  }
  0x66   :  { %248 = vsyncadd [#allocation4], 4294967168 }
  0x67   :  { %178 = vsyncpa [#allocation3], 1 }
  0x68   :  { %179 = vsyncpa [#allocation4], 1 }

</bundles_post_ra>
